<compile_context>
chip_gen: v5e
topology: v5e:2x2
jax: 0.10.0
libtpu: 0.0.40
codegen_flags: <defaults>
</compile_context>

<pallas_src>
import functools

import jax
import jax.numpy as jnp
from jax import lax
from jax.experimental import pallas as pl
from jax.experimental.pallas import tpu as pltpu

_LANES = 128
_EPS_SQ = 1e-24                       # F.normalize eps=1e-12, squared
_TABLE_VMEM_BUDGET = 4 << 20          # keep table resident in VMEM if <= 4 MiB


def _recon_loss_kernel(*refs, normalize, has_weight, fused_gather, batch, vocab):
    if fused_gather:
        idx_ref, table_ref, ref_ref = refs[:3]
        rest = refs[3:]
    else:
        vec_ref, ref_ref = refs[:2]
        rest = refs[2:]
    if has_weight:
        w_ref, out_ref = rest
    else:
        (out_ref,) = rest

    ref = ref_ref[...].astype(jnp.float32)              # (TB, D)
    tb = ref.shape[0]

    if fused_gather:
        # Embedding gather fused in-kernel: one-hot @ table on the (otherwise idle)
        # MXU.  The table block index is constant across the grid, so the table is
        # DMA'd into VMEM once and stays resident.
        idx = idx_ref[...]                               # (TB, 1) int32
        onehot = (idx == lax.broadcasted_iota(jnp.int32, (1, vocab), 1))
        onehot = onehot.astype(table_ref.dtype)          # (TB, V) exact 0/1
        vec = jnp.dot(onehot, table_ref[...],
                      preferred_element_type=jnp.float32)   # (TB, D) f32
    else:
        vec = vec_ref[...].astype(jnp.float32)

    if normalize:
        # ||v_hat - r_hat||^2 from three lane reductions; exact F.normalize
        # semantics (norm clamped at eps) without rescaling vec/ref elementwise.
        vv = jnp.sum(vec * vec, axis=-1, keepdims=True)     # (TB, 1)
        rr = jnp.sum(ref * ref, axis=-1, keepdims=True)
        vr = jnp.sum(vec * ref, axis=-1, keepdims=True)
        inv_v = lax.rsqrt(jnp.maximum(vv, jnp.float32(_EPS_SQ)))   # EUP
        inv_r = lax.rsqrt(jnp.maximum(rr, jnp.float32(_EPS_SQ)))
        per_row = (vv * inv_v * inv_v + rr * inv_r * inv_r
                   - 2.0 * vr * inv_v * inv_r)           # (TB, 1)
    else:
        diff = vec - ref
        per_row = jnp.sum(diff * diff, axis=-1, keepdims=True)   # (TB, 1)

    if has_weight:
        per_row = per_row * w_ref[...]                   # log(freq)

    # Mask the ragged tail rows of the last block.  Their contents come from the
    # boundary DMA padding (undefined, possibly NaN/Inf), so mask AFTER all per-row
    # math but BEFORE the block reduction: jnp.where drops any NaN in tail rows.
    row = pl.program_id(0) * tb + lax.broadcasted_iota(jnp.int32, (tb, 1), 0)
    per_row = jnp.where(row < batch, per_row, 0.0)

    total = jnp.sum(per_row, axis=0, keepdims=True)      # (1, 1) block partial sum
    out_ref[...] = jnp.broadcast_to(total, (1, _LANES))  # lane-dense store


def _round_up(x, m):
    return ((x + m - 1) // m) * m


def _sublane_multiple(dtype):
    # Sub-32-bit dtypes pack along sublanes: bf16 tiles are (16, 128), int8/fp8 (32, 128).
    return {4: 8, 2: 16, 1: 32}.get(jnp.dtype(dtype).itemsize, 8)


def _pick_tile_rows(batch, d, itemsize, sub, *, min_blocks=4,
                    vmem_budget_bytes=12 << 20, row_cap=2048):
    # Per row per pipeline step: ref (+ idx + weight) double-buffered in their native
    # dtype, plus ~3 f32 row-sized compute intermediates.  12 MiB keeps ample headroom
    # under v7x's 32 MiB scoped-VMEM default (64 MiB physical).
    bytes_per_row = 2 * (d * itemsize + 8) + 3 * d * 4
    tb = vmem_budget_bytes // max(bytes_per_row, 1)
    tb = min(tb, row_cap)
    # Keep >= min_blocks grid steps whenever the batch allows: restores input
    # double-buffering and gives v7x megacore balanced work on both TensorCores.
    tb = min(tb, (batch + min_blocks - 1) // min_blocks)
    tb = max(sub, (tb // sub) * sub)
    return tb


def reconstruction_loss(embedding_table, word_idx, ref_vector,
                        freq=None, normalize=False, tile_rows=None,
                        fuse_gather=None):
    """Pallas implementation of ReconstructionLoss.forward. Returns a scalar f32."""
    B, D = ref_vector.shape
    V, Dt = embedding_table.shape
    assert D == Dt, "embedding dim mismatch"

    ref_item = jnp.dtype(ref_vector.dtype).itemsize
    tab_item = jnp.dtype(embedding_table.dtype).itemsize
    table_bytes = V * D * tab_item
    if fuse_gather is None:
        fuse_gather = table_bytes <= _TABLE_VMEM_BUDGET

    # Sublane multiple for the row-blocked inputs (ref always; vec only when unfused).
    sub = _sublane_multiple(ref_vector.dtype)
    itemsize = ref_item
    if not fuse_gather:
        sub = max(sub, _sublane_multiple(embedding_table.dtype))
        itemsize = max(itemsize, tab_item)

    # NOTE: PyTorch nn.Embedding raises on out-of-range indices; here bad indices
    # silently yield a zero row (fused path) / clamped row (XLA gather fallback).
    word_idx = word_idx.astype(jnp.int32).reshape(B, 1)

    has_weight = freq is not None
    if has_weight:
        weight = jnp.log(freq.astype(jnp.float32)).reshape(B, 1)

    if tile_rows is not None:
        tb = max(sub, _round_up(int(tile_rows), sub))
    else:
        tb = _pick_tile_rows(B, D, itemsize, sub)
    num_blocks = (B + tb - 1) // tb

    kernel = functools.partial(
        _recon_loss_kernel, normalize=bool(normalize), has_weight=has_weight,
        fused_gather=bool(fuse_gather), batch=B, vocab=V)

    in_arrays = []
    in_specs = []
    if fuse_gather:
        in_arrays += [word_idx, embedding_table]
        in_specs += [
            pl.BlockSpec((tb, 1), lambda i: (i, 0)),   # word indices
            pl.BlockSpec((V, D), lambda i: (0, 0)),    # whole table, resident in VMEM
        ]
        gather_bytes = table_bytes + B * 4
        gather_flops = 2 * B * V * D
    else:
        # TODO(synk): for tables too large for VMEM, fuse the gather with a manual
        # double-buffered per-row DMA (memory_space=pl.ANY + make_async_copy) instead
        # of this XLA gather, which costs an extra (B, D) HBM round trip.
        vec = jnp.take(embedding_table, word_idx[:, 0], axis=0)     # (B, D)
        in_arrays += [vec]
        in_specs += [pl.BlockSpec((tb, D), lambda i: (i, 0))]
        gather_bytes = 2 * B * D * tab_item
        gather_flops = 0

    in_arrays += [ref_vector]
    in_specs += [pl.BlockSpec((tb, D), lambda i: (i, 0))]
    if has_weight:
        in_arrays += [weight]
        in_specs += [pl.BlockSpec((tb, 1), lambda i: (i, 0))]

    cost = pl.CostEstimate(
        flops=4 * B * D + gather_flops,
        transcendentals=(2 * B) if normalize else 0,
        bytes_accessed=(B * D * ref_item + gather_bytes
                        + (B * 4 if has_weight else 0)
                        + num_blocks * _LANES * 4),
    )

    partials = pl.pallas_call(
        kernel,
        out_shape=jax.ShapeDtypeStruct((1, _LANES * num_blocks), jnp.float32),
        grid=(num_blocks,),
        in_specs=in_specs,
        out_specs=pl.BlockSpec((1, _LANES), lambda i: (0, i)),
        compiler_params=pltpu.CompilerParams(
            dimension_semantics=("parallel",),          # batch blocks are independent
            vmem_limit_bytes=32 << 20),
        cost_estimate=cost,
    )(*in_arrays)

    # Each block broadcast its partial sum across its 128 output lanes; take lane 0.
    block_sums = partials.reshape(num_blocks, _LANES)[:, 0]
    return jnp.sum(block_sums) / jnp.float32(B * D)


def _reference_loss(embedding_table, word_idx, ref_vector, freq=None, normalize=False):
    vec = embedding_table[word_idx]
    ref = ref_vector
    if normalize:
        vec = vec / jnp.maximum(jnp.linalg.norm(vec, axis=1, keepdims=True), 1e-12)
        ref = ref / jnp.maximum(jnp.linalg.norm(ref, axis=1, keepdims=True), 1e-12)
    loss = jnp.mean((vec - ref) ** 2, axis=1)
    if freq is not None:
        loss = loss * jnp.log(freq)
    return jnp.mean(loss)


if __name__ == "__main__":
    key = jax.random.PRNGKey(0)
    (k_emb, k_idx, k_ref, k_freq, k_idx3, k_ref3, k_freq3) = jax.random.split(key, 7)

    VOCAB, D = 32, 128

    # Deterministic synthetic "w2v_model" weights (nn.Embedding(VOCAB, D)).
    # (Values made bf16-representable so the bf16 test case gathers identical rows.)
    embedding_table = jax.random.normal(k_emb, (VOCAB, D), dtype=jnp.float32)
    embedding_table = embedding_table.astype(jnp.bfloat16).astype(jnp.float32)

    RTOL, ATOL = 1e-4, 1e-5

    # Case 1: plain MSE, aligned batch, no freq (weight input not compiled in).
    B = 8
    word_idx = jax.random.randint(k_idx, (B,), 0, VOCAB, dtype=jnp.int32)
    ref_vector = jax.random.normal(k_ref, (B, D), dtype=jnp.float32)
    freq = jax.random.uniform(k_freq, (B,), minval=2.0, maxval=100.0,
                              dtype=jnp.float32)

    out1 = reconstruction_loss(embedding_table, word_idx, ref_vector)
    jax.block_until_ready(out1)
    exp1 = _reference_loss(embedding_table, word_idx, ref_vector)

    # Case 2: normalize + freq weighting (fused gather, weighted path).
    out2 = reconstruction_loss(embedding_table, word_idx, ref_vector,
                               freq=freq, normalize=True)
    jax.block_until_ready(out2)
    exp2 = _reference_loss(embedding_table, word_idx, ref_vector,
                           freq=freq, normalize=True)

    # Case 3: ragged batch (B % tile != 0), multi-block grid, in-kernel tail masking.
    B3 = 20
    word_idx3 = jax.random.randint(k_idx3, (B3,), 0, VOCAB, dtype=jnp.int32)
    ref_vector3 = jax.random.normal(k_ref3, (B3, D), dtype=jnp.float32)
    freq3 = jax.random.uniform(k_freq3, (B3,), minval=2.0, maxval=100.0,
                               dtype=jnp.float32)

    out3 = reconstruction_loss(embedding_table, word_idx3, ref_vector3,
                               freq=freq3, normalize=True, tile_rows=8)
    jax.block_until_ready(out3)
    exp3 = _reference_loss(embedding_table, word_idx3, ref_vector3,
                           freq=freq3, normalize=True)

    # Case 4: bf16 table + bf16 ref (16-row sublane multiple), ragged, auto tile.
    table_bf16 = embedding_table.astype(jnp.bfloat16)
    ref_bf16 = ref_vector3.astype(jnp.bfloat16)
    out4 = reconstruction_loss(table_bf16, word_idx3, ref_bf16,
                               freq=freq3, normalize=True)
    jax.block_until_ready(out4)
    exp4 = _reference_loss(table_bf16.astype(jnp.float32), word_idx3,
                           ref_bf16.astype(jnp.float32), freq=freq3, normalize=True)

    # Case 5: un-fused fallback path (large-vocab code path forced on small inputs).
    out5 = reconstruction_loss(embedding_table, word_idx3, ref_vector3,
                               freq=freq3, normalize=False, fuse_gather=False)
    jax.block_until_ready(out5)
    exp5 = _reference_loss(embedding_table, word_idx3, ref_vector3, freq=freq3)

    assert jnp.allclose(out1, exp1, rtol=RTOL, atol=ATOL), (out1, exp1)
    assert jnp.allclose(out2, exp2, rtol=RTOL, atol=ATOL), (out2, exp2)
    assert jnp.allclose(out3, exp3, rtol=RTOL, atol=ATOL), (out3, exp3)
    assert jnp.allclose(out4, exp4, rtol=RTOL, atol=ATOL), (out4, exp4)
    assert jnp.allclose(out5, exp5, rtol=RTOL, atol=ATOL), (out5, exp5)
    print("KERNEL_OK")
</pallas_src>

<mosaic_0001>
module attributes {stable_mosaic.version = 11 : i64} {
  func.func @_recon_loss_kernel(%arg0: i32, %arg1: memref<8x1xi32, #tpu.memory_space<vmem>>, %arg2: memref<32x128xf32, #tpu.memory_space<vmem>>, %arg3: memref<8x128xf32, #tpu.memory_space<vmem>>, %arg4: memref<1x128xf32, #tpu.memory_space<vmem>>) attributes {dimension_semantics = [#tpu.dimension_semantics<parallel>], iteration_bounds = array<i64: 1>, scalar_prefetch = 0 : i64, scratch_operands = 0 : i64, tpu.core_type = #tpu.core_type<tc>, window_params = [{transform_indices = @transform_0, window_bounds = array<i64: 8, 1>}, {pipeline_mode = #tpu.pipeline_mode<synchronous>, transform_indices = @transform_1, window_bounds = array<i64: 32, 128>}, {transform_indices = @transform_2, window_bounds = array<i64: 8, 128>}, {transform_indices = @transform_3, window_bounds = array<i64: 1, 128>}]} {
    %c0 = arith.constant 0 : index
    %c0_0 = arith.constant 0 : index
    %0 = vector.load %arg3[%c0, %c0_0] : memref<8x128xf32, #tpu.memory_space<vmem>>, vector<8x128xf32>
    %c0_1 = arith.constant 0 : index
    %c0_2 = arith.constant 0 : index
    %1 = vector.load %arg1[%c0_1, %c0_2] : memref<8x1xi32, #tpu.memory_space<vmem>>, vector<8x1xi32>
    %2 = tpu.iota {dimensions = array<i32: 1>} : vector<1x32xi32>
    %3 = vector.broadcast %1 : vector<8x1xi32> to vector<8x32xi32>
    %4 = vector.broadcast %2 : vector<1x32xi32> to vector<8x32xi32>
    %5 = arith.cmpi eq, %3, %4 : vector<8x32xi32>
    %6 = arith.extui %5 : vector<8x32xi1> to vector<8x32xi32>
    %7 = arith.sitofp %6 : vector<8x32xi32> to vector<8x32xf32>
    %c0_3 = arith.constant 0 : index
    %c0_4 = arith.constant 0 : index
    %8 = vector.load %arg2[%c0_3, %c0_4] : memref<32x128xf32, #tpu.memory_space<vmem>>, vector<32x128xf32>
    %cst = arith.constant dense<0.000000e+00> : vector<8x128xf32>
    %9 = tpu.matmul %7, %8, %cst {dimension_numbers = #tpu.dot_dimension_numbers<[1], [0], [0], [1], [0, 0, 1, 1], [], []>} : vector<8x32xf32>, vector<32x128xf32>, vector<8x128xf32> -> vector<8x128xf32>
    %10 = arith.subf %9, %0 : vector<8x128xf32>
    %11 = arith.mulf %10, %10 : vector<8x128xf32>
    %cst_5 = arith.constant dense<0.000000e+00> : vector<8xf32>
    %12 = vector.multi_reduction <add>, %11, %cst_5 [1] : vector<8x128xf32> to vector<8xf32>
    %13 = vector.shape_cast %12 : vector<8xf32> to vector<8x1xf32>
    %c8_i32 = arith.constant 8 : i32
    %14 = arith.muli %arg0, %c8_i32 : i32
    %15 = tpu.iota {dimensions = array<i32: 0>} : vector<8x1xi32>
    %16 = vector.broadcast %14 : i32 to vector<8x1xi32>
    %17 = arith.addi %16, %15 : vector<8x1xi32>
    %c8_i32_6 = arith.constant 8 : i32
    %18 = vector.broadcast %c8_i32_6 : i32 to vector<8x1xi32>
    %19 = arith.cmpi slt, %17, %18 : vector<8x1xi32>
    %cst_7 = arith.constant 0.000000e+00 : f32
    %20 = vector.broadcast %cst_7 : f32 to vector<8x1xf32>
    %21 = arith.select %19, %13, %20 : vector<8x1xi1>, vector<8x1xf32>
    %cst_8 = arith.constant dense<0.000000e+00> : vector<1xf32>
    %22 = vector.multi_reduction <add>, %21, %cst_8 [0] : vector<8x1xf32> to vector<1xf32>
    %23 = vector.shape_cast %22 : vector<1xf32> to vector<1x1xf32>
    %24 = vector.shape_cast %23 : vector<1x1xf32> to vector<1x1xf32>
    %25 = vector.broadcast %24 : vector<1x1xf32> to vector<1x128xf32>
    %c0_9 = arith.constant 0 : index
    %c0_10 = arith.constant 0 : index
    %26 = vector.load %arg4[%c0_9, %c0_10] : memref<1x128xf32, #tpu.memory_space<vmem>>, vector<1x128xf32>
    tpu.vector_store %arg4[%c0_9, %c0_10], %25 {strides = array<i32>} : memref<1x128xf32, #tpu.memory_space<vmem>>, vector<1x128xf32>,
    return
  }
  func.func @transform_0(%arg0: i32) -> (i32, i32) {
    %c0_i32 = arith.constant 0 : i32
    %c0_i32_0 = arith.constant 0 : i32
    return %arg0, %c0_i32 : i32, i32
  }
  func.func @transform_1(%arg0: i32) -> (i32, i32) {
    %c0_i32 = arith.constant 0 : i32
    %c0_i32_0 = arith.constant 0 : i32
    %c0_i32_1 = arith.constant 0 : i32
    return %c0_i32, %c0_i32_0 : i32, i32
  }
  func.func @transform_2(%arg0: i32) -> (i32, i32) {
    %c0_i32 = arith.constant 0 : i32
    %c0_i32_0 = arith.constant 0 : i32
    return %arg0, %c0_i32 : i32, i32
  }
  func.func @transform_3(%arg0: i32) -> (i32, i32) {
    %c0_i32 = arith.constant 0 : i32
    %c0_i32_0 = arith.constant 0 : i32
    return %c0_i32, %arg0 : i32, i32
  }
}

</mosaic_0001>

<bundles_post_ra>
// kernel: tpu_custom_call.1
= control target key start
LH: loop header
LB: loop body
LE: loop exit
PB: predicated region body
PF: predicated region fallthrough
CT: control target
= control target key end

     0   :  { %8 = vsyncpa [#allocation3], 0  ;;  %s203_s0 = inlined_call_operand.vmem [shape: s32[8,1], index: 0, kind: input, shape index: {}]   ;;  %s204_s1 = inlined_call_operand.hbm [shape: f32[32,128], index: 1, kind: input, shape index: {}]   ;;  %s205_s2 = inlined_call_operand.vmem [shape: f32[8,128], index: 2, kind: input, shape index: {}]   ;;  %s206_s3 = inlined_call_operand.hbm [shape: f32[1,128], index: 3, kind: output, shape index: {}]  }
   0x1   :  { %9 = vsyncpa [#allocation4], 0  ;;  %s16_s14 = sshll.u32 %s204_s1, 4  ;;  %s165_s15 = smov [#allocation2]   ;;  %s17_s14 = int_to_ptr.hbm [resolvable:$true] %s16_s14 }
   0x2   :  { %s18_s16 = sshll.u32 %s165_s15, 4  ;;  %s166_s17 = smov 128   ;;  %s19_s16 = int_to_ptr.vmem [resolvable:$true] %s18_s16 }
   0x3   :  { %s167_s18 = smov 8  }
   0x4   :  { %24 = dma.hbm_to_vmem [thread:$0]  %s17_s14, 512, %s19_s16, [#allocation3], %s166_s17, %s166_s17, %s167_s18  }
   0x5   :  { %161 = dma.done.wait [#allocation3], 512  }
   0x6   :  { %162 = vsyncadd [#allocation3], 4294966784  ;;  %v168_v0 = vmov 0   ;;  %v32_v1 = vld [vmem:[%s203_s0] sm:$0xff]  ;;  %v43_v3 = vld [vmem:[#allocation2 + $0x10] sm:$0xff]  ;;  %v33_v6 = vlaneseq  ;;  %vm45_vm0 = vcmask 261120  }
   0x7   :  { %112 = vset.pattern.permute.xlu0 %v168_v0  ;;  %v44_v2 = vld [vmem:[#allocation2 + $0x18] sm:$0xff]  ;;  %v42_v4 = vld [vmem:[#allocation2 + $0x8] sm:$0xff]  ;;  %v41_v5 = vld [vmem:[#allocation2] sm:$0xff]  ;;  %v169_v9 = vmov 0.0   ;;  %s170_s0 = smov [#allocation5]   ;;  %s94_s25 = sshll.u32 %s206_s3, 4  ;;  %s95_s25 = int_to_ptr.hbm [resolvable:$true] %s94_s25 }
   0x8   :  { %36 = vperm.xlu0 %112, %v32_v1   ;;  %61 = vmatpush.msra.mxu0 %v44_v2  ;;  %v34_v7 = vand.u32 127, %v33_v6  ;;  %v31_v11 = vld [vmem:[%s205_s2] sm:$0xff]  ;;  %s92_s22 = sshll.u32 %s170_s0, 4  ;;  %s93_s22 = int_to_ptr.vmem [resolvable:$true] %s92_s22 }
   0xa   :  { %62 = vmatpush.msra.mxu0 %v43_v3 }
   0xc   :  { %63 = vmatpush.msra.mxu0 %v42_v4 }
   0xe   :  { %64 = vmatpush.msra.mxu0 %v41_v5 }
  0x7a   :  { %v37_v8 = vpop.permute.xlu0 %36 }
  0x7b   :  { %vm38_vm1 = vcmp.eq.s32.totalorder %v37_v8, %v34_v7 }
  0x7c   :  { %v104_v10 = vsel %vm38_vm1, 1.0, %v169_v9 }
  0x7d   :  { %105 = vmatmul.msk.f32.vlgmr.msra.gmra.mxu0 %vm45_vm0, %v104_v10 }
  0xfa   :  { %v66_v12 = vpop.f32.mrf.mxu0 }
  0xfb   :  { %v69_v13 = vsub.f32 %v66_v12, %v31_v11 }
  0xfd   :  { %v70_v14 = vmul.f32 %v69_v13, %v69_v13 }
  0xff   :  { %71 = vadd.xlane.f32.xlu0 %v70_v14 }
 0x172   :  { %v72_v15 = vpop.xlane.xlu0 %71 }
 0x173   :  { %v80_v16 = vrot.slane %v72_v15, 4 }
 0x175   :  { %v81_v17 = vadd.f32 %v80_v16, %v72_v15 }
 0x177   :  { %v82_v18 = vrot.slane %v81_v17, 2 }
 0x179   :  { %v83_v19 = vadd.f32 %v82_v18, %v81_v17 }
 0x17b   :  { %v84_v20 = vrot.slane %v83_v19, 1 }
 0x17d   :  { %v85_v21 = vadd.f32 %v84_v20, %v83_v19 }
 0x17f   :  { %86 = vst [vmem:[#allocation5] sm:$0x1] %v85_v21 }
 0x180   :  { %97 = dma.vmem_to_hbm [thread:$0]  %s93_s22, 16, %s95_s25, [#allocation4]  }
 0x181   :  { %163 = dma.done.wait [#allocation4], 16  }
 0x182   :  { %164 = vsyncadd [#allocation4], 4294967280 }
 0x183   :  { %102 = vsyncpa [#allocation3], 1 }
 0x184   :  { %103 = vsyncpa [#allocation4], 1 }

</bundles_post_ra>
